<compile_context>
chip_gen: v7x
topology: tpu7x:2x2x1
jax: 0.10.0
libtpu: 0.0.40
codegen_flags: <defaults>
</compile_context>

<pallas_src>
import jax
import jax.numpy as jnp
from jax import lax
from jax.experimental import pallas as pl
from jax.experimental.pallas import tpu as pltpu


def _round_up(n: int, m: int) -> int:
    return ((n + m - 1) // m) * m


def _linear_policy_kernel(x_ref, w_ref, b_ref, o_ref):
    # x_ref: (TB, F)      batch tile of full features (bf16 or f32)
    # w_ref: (F, A_pad)   gather-folded, pre-transposed, lane-padded weight
    # b_ref: (1, A_pad)   f32 bias; padded columns = -1e30 (mask them out of softmax)
    # o_ref: (TB, A)      f32 probabilities (unpadded output block)
    logits = jnp.dot(x_ref[...], w_ref[...],
                     preferred_element_type=jnp.float32) + b_ref[...]
    m = jnp.max(logits, axis=-1, keepdims=True)
    e = jnp.exp(logits - m)                      # padded lanes -> exp(-huge) = 0
    s = jnp.sum(e, axis=-1, keepdims=True)
    probs = e / s                                # exact normalization (rows sum to 1)
    o_ref[...] = probs[:, : o_ref.shape[1]].astype(o_ref.dtype)


def linear_policy_forward(x, target_set, weight, bias, *, block_b=1024,
                          input_dtype=jnp.bfloat16,
                          vmem_budget_bytes=32 * 1024 * 1024):
    """Softmax(Linear(x[:, target_set])) as a single Pallas kernel.

    x: (B, F) float; target_set: 1-D int indices (len D); weight: (A, D); bias: (A,).
    Returns (B, A) float32 probabilities.
    """
    B, F = x.shape
    A, D = weight.shape
    target_set = jnp.asarray(target_set, dtype=jnp.int32)
    assert target_set.shape[0] == D

    # Lane-dense MXU N dimension.
    A_pad = _round_up(max(A, 128), 128)

    # Fold the column gather into a pre-transposed weight:
    #   x @ w_scat == x[:, target_set] @ weight.T
    # .add (not .set) so duplicated indices in target_set accumulate, matching the ref.
    w_scat = jnp.zeros((F, A_pad), dtype=jnp.float32).at[target_set, :A].add(
        weight.astype(jnp.float32).T)
    # Padded bias entries are -1e30 so padded logits vanish under exp(); stays f32.
    b_pad = jnp.full((1, A_pad), -1e30, dtype=jnp.float32).at[0, :A].set(
        bias.astype(jnp.float32))

    x_in = x.astype(input_dtype)
    w_in = w_scat.astype(input_dtype)
    in_bytes = jnp.dtype(input_dtype).itemsize

    # --- VMEM-aware batch-tile sizing (pipeline double-buffers every operand) ---
    fixed_bytes = 2 * F * A_pad * in_bytes + 2 * A_pad * 4        # weight + bias
    per_row_bytes = 2 * F * in_bytes + 2 * A * 4                  # x tile + output tile
    tb_vmem = max((vmem_budget_bytes - fixed_bytes) // max(per_row_bytes, 1), 8)
    tb_vmem = max((tb_vmem // 8) * 8, 8)

    B_r8 = _round_up(B, 8)
    TB = min(_round_up(block_b, 8), tb_vmem, B_r8)
    # Keep >= 2 grid steps so "parallel" can shard the batch across v7x's 2 TCs.
    TB = min(TB, max(_round_up(pl.cdiv(B_r8, 2), 8), 8))
    TB = max(TB, 8)

    B_pad = _round_up(B, TB)
    if B_pad != B:
        x_in = jnp.pad(x_in, ((0, B_pad - B), (0, 0)))

    out = pl.pallas_call(
        _linear_policy_kernel,
        out_shape=jax.ShapeDtypeStruct((B_pad, A), jnp.float32),
        grid_spec=pltpu.PrefetchScalarGridSpec(
            num_scalar_prefetch=0,
            grid=(B_pad // TB,),
            in_specs=[
                pl.BlockSpec((TB, F), lambda i: (i, 0)),       # batch tile of x
                pl.BlockSpec((F, A_pad), lambda i: (0, 0)),    # resident weight
                pl.BlockSpec((1, A_pad), lambda i: (0, 0)),    # resident bias
            ],
            out_specs=pl.BlockSpec((TB, A), lambda i: (i, 0)),  # unpadded output
        ),
        compiler_params=pltpu.CompilerParams(
            dimension_semantics=("parallel",),                  # megacore on v7x
            vmem_limit_bytes=48 * 1024 * 1024,
        ),
    )(x_in, w_in, b_pad)

    if B_pad != B:
        out = out[:B]
    return out


if __name__ == "__main__":
    key = jax.random.PRNGKey(0)
    k_x, k_w, k_b = jax.random.split(key, 3)

    # Small shapes consistent with the module.
    B = 8            # batch
    F = 32           # full feature dim of X
    # len(target_set) = 16; includes a duplicate index to exercise the .add fold.
    target_set = jnp.array([0, 2, 4, 6, 8, 10, 12, 14, 16, 18, 20, 22, 24, 26, 28, 2],
                           dtype=jnp.int32)
    D = int(target_set.shape[0])
    A = 8            # n_actions

    x = jax.random.normal(k_x, (B, F), dtype=jnp.float32)

    # Deterministic nn.Linear-style init: U(-1/sqrt(D), 1/sqrt(D))
    bound = 1.0 / jnp.sqrt(jnp.float32(D))
    weight = jax.random.uniform(k_w, (A, D), minval=-bound, maxval=bound,
                                dtype=jnp.float32)
    bias = jax.random.uniform(k_b, (A,), minval=-bound, maxval=bound,
                              dtype=jnp.float32)

    def reference(xv):
        logits = jnp.dot(xv[:, target_set], weight.T,
                         precision=lax.Precision.HIGHEST) + bias
        return jax.nn.softmax(logits, axis=1)

    # --- Test 1: default (bf16 inputs, f32 accumulation / softmax). ---
    probs = jax.block_until_ready(linear_policy_forward(x, target_set, weight, bias))
    ref = reference(x)
    assert probs.shape == (B, A)
    assert jnp.allclose(probs, ref, atol=5e-3, rtol=5e-3)
    assert jnp.allclose(jnp.sum(probs, axis=1), 1.0, atol=1e-4)   # exact normalization

    # --- Test 2: f32 path + ragged batch (exercises batch padding / 2-step grid). ---
    B2 = 13
    x2 = jax.random.normal(jax.random.PRNGKey(1), (B2, F), dtype=jnp.float32)
    probs2 = jax.block_until_ready(
        linear_policy_forward(x2, target_set, weight, bias,
                              input_dtype=jnp.float32))
    ref2 = reference(x2)
    assert probs2.shape == (B2, A)
    assert jnp.allclose(probs2, ref2, atol=2e-3, rtol=2e-3)
    assert jnp.allclose(jnp.sum(probs2, axis=1), 1.0, atol=1e-4)

    # TODO(synk): get_actions/vectorized (host-side numpy categorical sampling) is not
    # part of forward() and is left to the caller.
    print("KERNEL_OK")
</pallas_src>

<mosaic_0001>
module attributes {stable_mosaic.version = 11 : i64} {
  func.func @_linear_policy_kernel(%arg0: i32, %arg1: memref<8x32xbf16, #tpu.memory_space<vmem>>, %arg2: memref<32x128xbf16, #tpu.memory_space<vmem>>, %arg3: memref<1x128xf32, #tpu.memory_space<vmem>>, %arg4: memref<8x8xf32, #tpu.memory_space<vmem>>) attributes {dimension_semantics = [#tpu.dimension_semantics<parallel>], iteration_bounds = array<i64: 1>, scalar_prefetch = 0 : i64, scratch_operands = 0 : i64, tpu.core_type = #tpu.core_type<tc>, window_params = [{transform_indices = @transform_0, window_bounds = array<i64: 8, 32>}, {pipeline_mode = #tpu.pipeline_mode<synchronous>, transform_indices = @transform_1, window_bounds = array<i64: 32, 128>}, {pipeline_mode = #tpu.pipeline_mode<synchronous>, transform_indices = @transform_2, window_bounds = array<i64: 1, 128>}, {transform_indices = @transform_3, window_bounds = array<i64: 8, 8>}]} {
    %c0 = arith.constant 0 : index
    %c0_0 = arith.constant 0 : index
    %0 = vector.load %arg1[%c0, %c0_0] : memref<8x32xbf16, #tpu.memory_space<vmem>>, vector<8x32xbf16>
    %c0_1 = arith.constant 0 : index
    %c0_2 = arith.constant 0 : index
    %1 = vector.load %arg2[%c0_1, %c0_2] : memref<32x128xbf16, #tpu.memory_space<vmem>>, vector<32x128xbf16>
    %cst = arith.constant dense<0.000000e+00> : vector<8x128xf32>
    %2 = tpu.matmul %0, %1, %cst {dimension_numbers = #tpu.dot_dimension_numbers<[1], [0], [0], [1], [0, 0, 1, 1], [], []>} : vector<8x32xbf16>, vector<32x128xbf16>, vector<8x128xf32> -> vector<8x128xf32>
    %c0_3 = arith.constant 0 : index
    %c0_4 = arith.constant 0 : index
    %3 = vector.load %arg3[%c0_3, %c0_4] : memref<1x128xf32, #tpu.memory_space<vmem>>, vector<1x128xf32>
    %4 = vector.broadcast %3 : vector<1x128xf32> to vector<8x128xf32>
    %5 = arith.addf %2, %4 : vector<8x128xf32>
    %cst_5 = arith.constant dense<0xFF800000> : vector<8xf32>
    %6 = vector.multi_reduction <maximumf>, %5, %cst_5 [1] : vector<8x128xf32> to vector<8xf32>
    %7 = vector.shape_cast %6 : vector<8xf32> to vector<8x1xf32>
    %8 = vector.broadcast %7 : vector<8x1xf32> to vector<8x128xf32>
    %9 = arith.subf %5, %8 : vector<8x128xf32>
    %10 = math.exp %9 : vector<8x128xf32>
    %cst_6 = arith.constant dense<0.000000e+00> : vector<8xf32>
    %11 = vector.multi_reduction <add>, %10, %cst_6 [1] : vector<8x128xf32> to vector<8xf32>
    %12 = vector.shape_cast %11 : vector<8xf32> to vector<8x1xf32>
    %13 = vector.broadcast %12 : vector<8x1xf32> to vector<8x128xf32>
    %14 = arith.divf %10, %13 : vector<8x128xf32>
    %15 = vector.extract_strided_slice %14 {offsets = [0, 0], sizes = [8, 8], strides = [1, 1]} : vector<8x128xf32> to vector<8x8xf32>
    %c0_7 = arith.constant 0 : index
    %c0_8 = arith.constant 0 : index
    %16 = vector.load %arg4[%c0_7, %c0_8] : memref<8x8xf32, #tpu.memory_space<vmem>>, vector<8x8xf32>
    tpu.vector_store %arg4[%c0_7, %c0_8], %15 {strides = array<i32>} : memref<8x8xf32, #tpu.memory_space<vmem>>, vector<8x8xf32>,
    return
  }
  func.func @transform_0(%arg0: i32) -> (i32, i32) {
    %c0_i32 = arith.constant 0 : i32
    %c0_i32_0 = arith.constant 0 : i32
    return %arg0, %c0_i32 : i32, i32
  }
  func.func @transform_1(%arg0: i32) -> (i32, i32) {
    %c0_i32 = arith.constant 0 : i32
    %c0_i32_0 = arith.constant 0 : i32
    %c0_i32_1 = arith.constant 0 : i32
    return %c0_i32, %c0_i32_0 : i32, i32
  }
  func.func @transform_2(%arg0: i32) -> (i32, i32) {
    %c0_i32 = arith.constant 0 : i32
    %c0_i32_0 = arith.constant 0 : i32
    %c0_i32_1 = arith.constant 0 : i32
    return %c0_i32, %c0_i32_0 : i32, i32
  }
  func.func @transform_3(%arg0: i32) -> (i32, i32) {
    %c0_i32 = arith.constant 0 : i32
    %c0_i32_0 = arith.constant 0 : i32
    return %arg0, %c0_i32 : i32, i32
  }
}

</mosaic_0001>

<bundles_post_ra>
// kernel: tpu_custom_call.1
= control target key start
LH: loop header
LB: loop body
LE: loop exit
PB: predicated region body
PF: predicated region fallthrough
CT: control target
= control target key end

     0   :  { %8 = vsyncpa [#allocation3], 0  ;;  %s310_s0 = inlined_call_operand.hbm [shape: bf16[8,32], index: 0, kind: input, shape index: {}]   ;;  %s311_s1 = inlined_call_operand.hbm [shape: bf16[32,128], index: 1, kind: input, shape index: {}]   ;;  %s312_s2 = inlined_call_operand.vmem [shape: f32[1,128], index: 2, kind: input, shape index: {}]   ;;  %s313_s3 = inlined_call_operand.hbm [shape: f32[8,8], index: 3, kind: output, shape index: {}]  }
   0x1   :  { %9 = vsyncpa [#allocation6], 0 }
   0x2   :  { %10 = vsyncpa [#allocation4], 0  ;;  %s237_s12 = smov [#allocation2]   ;;  %s238_s14 = smov [#allocation5]  }
   0x3   :  { %s17_s13 = sshll.u32 %s237_s12, 4  ;;  %s26_s15 = sshll.u32 %s238_s14, 4  ;;  %s18_s13 = int_to_ptr.vmem [resolvable:$true] %s17_s13  ;;  %s264_s15 = int_to_ptr.vmem [resolvable:$true] %s26_s15 }
   0x4   :  { %s165_s18 = scalar_lea.hbm %s310_s0, 64 }
   0x5   :  { %p166_p0 = scmp.ne.s32.totalorder %s310_s0, %s165_s18  ;;  %p169_p1 = scmp.lt.u32.totalorder %s165_s18, %s310_s0 }
   0x7   :  { %p171_p2 = pnand %p169_p1, %p166_p0 }
   0x9   :  { %174 = shalt.err (!%p171_p2)
}
   0xa   :  { %s175_s23 = scalar_lea.vmem %s18_s13, 64  ;;  %p180_p4 = scmp.lt.s32.totalorder %s18_s13, %s18_s13 }
   0xb   :  { %p176_p3 = scmp.ne.s32.totalorder %s18_s13, %s175_s23  ;;  %p181_p5 = scmp.lt.s32.totalorder %s175_s23, %s175_s23 }
   0xd   :  { %p182_p6 = por %p181_p5, %p180_p4 }
   0xf   :  { %p183_p7 = pnand %p182_p6, %p176_p3 }
  0x11   :  { %186 = shalt.err (!%p183_p7)
}
  0x12   :  { %20 = dma.hbm_to_vmem [thread:$0]  %s310_s0, 64, %s18_s13, [#allocation3]  }
  0x13   :  { %s187_s28 = scalar_lea.hbm %s311_s1, 256 }
  0x14   :  { %p188_p8 = scmp.ne.s32.totalorder %s311_s1, %s187_s28  ;;  %p191_p9 = scmp.lt.u32.totalorder %s187_s28, %s311_s1 }
  0x16   :  { %p193_p10 = pnand %p191_p9, %p188_p8 }
  0x18   :  { %196 = shalt.err (!%p193_p10)
}
  0x19   :  { %s197_s6 = scalar_lea.vmem %s264_s15, 256  ;;  %p202_p12 = scmp.lt.s32.totalorder %s264_s15, %s264_s15 }
  0x1a   :  { %p198_p11 = scmp.ne.s32.totalorder %s264_s15, %s197_s6  ;;  %p203_p13 = scmp.lt.s32.totalorder %s197_s6, %s197_s6 }
  0x1c   :  { %p204_p0 = por %p203_p13, %p202_p12 }
  0x1e   :  { %p205_p1 = pnand %p204_p0, %p198_p11 }
  0x20   :  { %208 = shalt.err (!%p205_p1)
}
  0x21   :  { %s239_s0 = smov 64   ;;  %s240_s7 = smov 4  }
  0x22   :  { %32 = dma.hbm_to_vmem [thread:$0]  %s311_s1, 256, %s264_s15, [#allocation6], %s239_s0, %s239_s0, %s240_s7  }
  0x23   :  { %231 = dma.done.wait [#allocation3], 64  }
  0x24   :  { %232 = vsyncadd [#allocation3], 4294967232 }
  0x25   :  { %233 = dma.done.wait [#allocation6], 256  }
  0x26   :  { %234 = vsyncadd [#allocation6], 4294967040  ;;  %v241_v0 = vmov 0.0   ;;  %vm242_vm0 = vmmov 0   ;;  %v159_v1 = vld [vmem:[#allocation5] sm:$0xff]   ;;  %v160_v2 = vld [vmem:[#allocation5 + $0x8] sm:$0xff]  }
  0x27   :  { %144 = vmatprep.subr.bf16.mxu0 %v241_v0  ;;  %148 = vmatprep.mubr.msk.bf16.mxu0 %vm242_vm0, %v241_v0  ;;  %v42_v3 = vld [vmem:[#allocation2] sm:$0xf]  ;;  %vm66_vm1 = vcmask 261120   ;;  %s243_s1 = smov [#allocation7]   ;;  %vm119_vm2 = vcmask 64512  }
  0x28   :  { %145 = vmatpush3.bf16.msra.mxu0 %v159_v1  ;;  %v137_v4 = vld [vmem:[%s312_s2] ss:$0 sm:$0xff]  ;;  %s127_s12 = sshll.u32 %s243_s1, 4  ;;  %s128_s12 = int_to_ptr.vmem [resolvable:$true] %s127_s12 }
  0x29   :  { %146 = vmatprep.subr.bf16.mxu0 %v241_v0  ;;  %s209_s2 = scalar_lea.vmem %s128_s12, 128  ;;  %p214_p3 = scmp.lt.s32.totalorder %s128_s12, %s128_s12 }
  0x2a   :  { %p210_p2 = scmp.ne.s32.totalorder %s128_s12, %s209_s2  ;;  %p215_p4 = scmp.lt.s32.totalorder %s209_s2, %s209_s2 }
  0x2c   :  { %147 = vmatpush3.bf16.msra.mxu0 %v160_v2  ;;  %p216_p5 = por %p215_p4, %p214_p3 }
  0x2e   :  { %p217_p6 = pnand %p216_p5, %p210_p2 }
  0x2f   :  { %149 = vmatmul.mubr.msk.bf16.vlgmr.msra.gmra.mrb[0].mxu0 %vm66_vm1, %v42_v3 }
 0x102   :  { %v104_v5 = vpop.f32.mrb[0].mxu0 }
 0x103   :  { %v105_v6 = vadd.f32 %v137_v4, %v104_v5  ;;  %v150_v7 = vpop.f32.mrb[1].mxu0 }
 0x104   :  { %v107_v8 = vpop.f32.mrb[2].mxu0 }
 0x105   :  { %110 = vmax.xlane.f32.xlu0 %v105_v6  ;;  %v151_v9 = vpop.f32.mrb[3].mxu0 }
 0x192   :  { %v111_v10 = vpop.xlane.xlu0 %110 }
 0x193   :  { %v112_v11 = vsub.f32 %v105_v6, %v111_v10 }
 0x195   :  { %v113_v12 = vmul.f32 1.442695, %v112_v11 }
 0x197   :  { %161 = vpow2.f32 %v113_v12 }
 0x1a1   :  { %v162_v13 = vpop.eup %161 }
 0x1a2   :  { %115 = vadd.xlane.f32.xlu0 %v162_v13 }
 0x22f   :  { %v116_v14 = vpop.xlane.xlu0 %115 }
 0x230   :  { %163 = vrcp.f32 %v116_v14 }
 0x23a   :  { %v164_v15 = vpop.eup %163 }
 0x23b   :  { %v118_v16 = vmul.f32 %v164_v15, %v162_v13 }
 0x23d   :  { %120 = vst.msk [vmem:[#allocation7] sm:$0xff] %vm119_vm2, %v118_v16 }
 0x23e   :  { %220 = shalt.err (!%p217_p6)
}
 0x23f   :  { %s221_s15 = scalar_lea.hbm %s313_s3, 128 }
 0x240   :  { %p222_p7 = scmp.ne.s32.totalorder %s313_s3, %s221_s15  ;;  %p225_p8 = scmp.lt.u32.totalorder %s221_s15, %s313_s3 }
 0x242   :  { %p227_p9 = pnand %p225_p8, %p222_p7 }
 0x244   :  { %230 = shalt.err (!%p227_p9)
}
 0x245   :  { %130 = dma.vmem_to_hbm [thread:$0]  %s128_s12, 128, %s313_s3, [#allocation4]  }
 0x246   :  { %235 = dma.done.wait [#allocation4], 128  }
 0x247   :  { %236 = vsyncadd [#allocation4], 4294967168 }
 0x248   :  { %134 = vsyncpa [#allocation3], 1 }
 0x249   :  { %135 = vsyncpa [#allocation6], 1 }
 0x24a   :  { %136 = vsyncpa [#allocation4], 1 }

</bundles_post_ra>
